<compile_context>
chip_gen: v7x
topology: tpu7x:2x2x1
jax: 0.10.0
libtpu: 0.0.40
codegen_flags: <defaults>
</compile_context>

<pallas_src>
import jax
import jax.numpy as jnp
from jax.experimental import pallas as pl
from jax.experimental.pallas import tpu as pltpu


def _round_up(x, m):
    return (x + m - 1) // m * m


def _conv_bn_kernel(x_ref, w_ref, scale_ref, bias_ref, o_ref):
    # x_ref:     (tm, K)   bf16 im2col patches
    # w_ref:     (K, tn)   bf16 reshaped conv weight
    # scale_ref: (1, tn)   f32  = gamma / sqrt(running_var + eps)
    # bias_ref:  (1, tn)   f32  = beta - running_mean * scale
    acc = jnp.dot(x_ref[...], w_ref[...], preferred_element_type=jnp.float32)
    o_ref[...] = (acc * scale_ref[...] + bias_ref[...]).astype(o_ref.dtype)


def downsample_d_forward(x, weight, gamma, beta, running_mean, running_var, eps=1e-5):
    """x: (N, Cin, H, W) f32; weight: (Cout, Cin, 2, 2); BN params: (Cout,). Returns NCHW f32."""
    N, Cin, H, W = x.shape
    Cout = weight.shape[0]
    assert H % 2 == 0 and W % 2 == 0
    OH, OW = H // 2, W // 2
    M = N * OH * OW
    K = Cin * 4

    # ---- glue: space-to-depth (im2col for k=2, s=2, p=0), Cin-minor layout ----
    # Cast to bf16 first so the XLA transpose copy moves half the bytes.
    xb = x.astype(jnp.bfloat16)
    patches = xb.reshape(N, Cin, OH, 2, OW, 2)                 # (n, ci, oh, kh, ow, kw)
    patches = jnp.transpose(patches, (0, 2, 4, 3, 5, 1))       # (n, oh, ow, kh, kw, ci)
    patches = patches.reshape(M, K)

    # weight (Cout, Cin, 2, 2) -> (kh, kw, ci, co) -> (K, Cout), matching patch column order.
    wmat = jnp.transpose(weight, (2, 3, 1, 0)).reshape(K, Cout).astype(jnp.bfloat16)

    # fold inference-mode BN into per-channel scale / bias (kept in f32).
    scale = (gamma / jnp.sqrt(running_var + eps)).astype(jnp.float32)
    bias = (beta - running_mean * scale).astype(jnp.float32)

    # ---- tiling & lane-dense padding ----
    tm = 512 if M >= 512 else _round_up(M, 8)
    M_pad = _round_up(M, tm)
    Cout_pad = _round_up(Cout, 128)
    tn = 256 if Cout_pad % 256 == 0 else 128

    if M_pad != M:
        patches = jnp.pad(patches, ((0, M_pad - M), (0, 0)))
    if Cout_pad != Cout:
        wmat = jnp.pad(wmat, ((0, 0), (0, Cout_pad - Cout)))
        scale = jnp.pad(scale, (0, Cout_pad - Cout))
        bias = jnp.pad(bias, (0, Cout_pad - Cout))
    scale2 = scale.reshape(1, Cout_pad)
    bias2 = bias.reshape(1, Cout_pad)

    grid = (M_pad // tm, Cout_pad // tn)

    out_flat = pl.pallas_call(
        _conv_bn_kernel,
        out_shape=jax.ShapeDtypeStruct((M_pad, Cout_pad), jnp.float32),
        grid=grid,
        in_specs=[
            pl.BlockSpec((tm, K), lambda i, j: (i, 0)),    # patches: walks M, full K
            pl.BlockSpec((K, tn), lambda i, j: (0, j)),    # weight: resident per Cout tile
            pl.BlockSpec((1, tn), lambda i, j: (0, j)),    # BN scale
            pl.BlockSpec((1, tn), lambda i, j: (0, j)),    # BN bias
        ],
        out_specs=pl.BlockSpec((tm, tn), lambda i, j: (i, j)),
        compiler_params=pltpu.CompilerParams(
            dimension_semantics=("parallel", "parallel"),
        ),
    )(patches, wmat, scale2, bias2)

    # ---- glue: strip padding, back to NCHW ----
    out = out_flat[:M, :Cout].reshape(N, OH, OW, Cout)
    out = jnp.transpose(out, (0, 3, 1, 2))
    return out


def _reference(x, weight, gamma, beta, running_mean, running_var, eps=1e-5,
               input_dtype=jnp.float32):
    """Pure-JAX reference (lax conv + inference BN) for validation."""
    y = jax.lax.conv_general_dilated(
        x.astype(input_dtype), weight.astype(input_dtype),
        window_strides=(2, 2), padding="VALID",
        dimension_numbers=("NCHW", "OIHW", "NCHW"),
        preferred_element_type=jnp.float32,
    )
    s = (gamma / jnp.sqrt(running_var + eps)).reshape(1, -1, 1, 1)
    b = (beta - running_mean * gamma / jnp.sqrt(running_var + eps)).reshape(1, -1, 1, 1)
    return y * s + b


if __name__ == "__main__":
    key = jax.random.PRNGKey(0)
    k_x, k_w, k_g, k_b, k_m, k_v = jax.random.split(key, 6)

    N, Cin, H, W = 2, 4, 16, 16
    Cout, stride = 8, 2

    x = jax.random.normal(k_x, (N, Cin, H, W), dtype=jnp.float32)
    weight = jax.random.normal(k_w, (Cout, Cin, 2, 2), dtype=jnp.float32) * 0.1
    gamma = jax.random.uniform(k_g, (Cout,), dtype=jnp.float32, minval=0.5, maxval=1.5)
    beta = jax.random.normal(k_b, (Cout,), dtype=jnp.float32) * 0.1
    running_mean = jax.random.normal(k_m, (Cout,), dtype=jnp.float32) * 0.1
    running_var = jax.random.uniform(k_v, (Cout,), dtype=jnp.float32, minval=0.5, maxval=1.5)

    out = downsample_d_forward(x, weight, gamma, beta, running_mean, running_var)
    out = jax.block_until_ready(out)
    assert out.shape == (N, Cout, H // stride, W // stride)

    # Tight check vs a reference using the same bf16 operand precision (f32 accumulate).
    ref_bf16 = _reference(x, weight, gamma, beta, running_mean, running_var,
                          input_dtype=jnp.bfloat16)
    assert jnp.allclose(out, ref_bf16, atol=1e-3, rtol=1e-3), "mismatch vs bf16-input reference"

    # Loose sanity check vs the full-f32 reference (bf16 MXU operands loosen the tolerance).
    ref_f32 = _reference(x, weight, gamma, beta, running_mean, running_var,
                         input_dtype=jnp.float32)
    assert jnp.allclose(out, ref_f32, atol=5e-2, rtol=5e-2), "mismatch vs f32 reference"

    print("KERNEL_OK")
</pallas_src>

<mosaic_0001>
module attributes {stable_mosaic.version = 11 : i64} {
  func.func @_conv_bn_kernel(%arg0: i32, %arg1: i32, %arg2: memref<128x16xbf16, #tpu.memory_space<vmem>>, %arg3: memref<16x128xbf16, #tpu.memory_space<vmem>>, %arg4: memref<1x128xf32, #tpu.memory_space<vmem>>, %arg5: memref<1x128xf32, #tpu.memory_space<vmem>>, %arg6: memref<128x128xf32, #tpu.memory_space<vmem>>) attributes {dimension_semantics = [#tpu.dimension_semantics<parallel>, #tpu.dimension_semantics<parallel>], iteration_bounds = array<i64: 1, 1>, scalar_prefetch = 0 : i64, scratch_operands = 0 : i64, tpu.core_type = #tpu.core_type<tc>, window_params = [{transform_indices = @transform_0, window_bounds = array<i64: 128, 16>}, {transform_indices = @transform_1, window_bounds = array<i64: 16, 128>}, {transform_indices = @transform_2, window_bounds = array<i64: 1, 128>}, {transform_indices = @transform_3, window_bounds = array<i64: 1, 128>}, {transform_indices = @transform_4, window_bounds = array<i64: 128, 128>}]} {
    %c0 = arith.constant 0 : index
    %c0_0 = arith.constant 0 : index
    %0 = vector.load %arg2[%c0, %c0_0] : memref<128x16xbf16, #tpu.memory_space<vmem>>, vector<128x16xbf16>
    %c0_1 = arith.constant 0 : index
    %c0_2 = arith.constant 0 : index
    %1 = vector.load %arg3[%c0_1, %c0_2] : memref<16x128xbf16, #tpu.memory_space<vmem>>, vector<16x128xbf16>
    %cst = arith.constant dense<0.000000e+00> : vector<128x128xf32>
    %2 = tpu.matmul %0, %1, %cst {dimension_numbers = #tpu.dot_dimension_numbers<[1], [0], [0], [1], [0, 0, 1, 1], [], []>} : vector<128x16xbf16>, vector<16x128xbf16>, vector<128x128xf32> -> vector<128x128xf32>
    %c0_3 = arith.constant 0 : index
    %c0_4 = arith.constant 0 : index
    %3 = vector.load %arg4[%c0_3, %c0_4] : memref<1x128xf32, #tpu.memory_space<vmem>>, vector<1x128xf32>
    %4 = vector.broadcast %3 : vector<1x128xf32> to vector<128x128xf32>
    %5 = arith.mulf %2, %4 : vector<128x128xf32>
    %c0_5 = arith.constant 0 : index
    %c0_6 = arith.constant 0 : index
    %6 = vector.load %arg5[%c0_5, %c0_6] : memref<1x128xf32, #tpu.memory_space<vmem>>, vector<1x128xf32>
    %7 = vector.broadcast %6 : vector<1x128xf32> to vector<128x128xf32>
    %8 = arith.addf %5, %7 : vector<128x128xf32>
    %c0_7 = arith.constant 0 : index
    %c0_8 = arith.constant 0 : index
    %9 = vector.load %arg6[%c0_7, %c0_8] : memref<128x128xf32, #tpu.memory_space<vmem>>, vector<128x128xf32>
    tpu.vector_store %arg6[%c0_7, %c0_8], %8 {strides = array<i32>} : memref<128x128xf32, #tpu.memory_space<vmem>>, vector<128x128xf32>,
    return
  }
  func.func @transform_0(%arg0: i32, %arg1: i32) -> (i32, i32) {
    %c0_i32 = arith.constant 0 : i32
    %c0_i32_0 = arith.constant 0 : i32
    return %arg0, %c0_i32 : i32, i32
  }
  func.func @transform_1(%arg0: i32, %arg1: i32) -> (i32, i32) {
    %c0_i32 = arith.constant 0 : i32
    %c0_i32_0 = arith.constant 0 : i32
    return %c0_i32, %arg1 : i32, i32
  }
  func.func @transform_2(%arg0: i32, %arg1: i32) -> (i32, i32) {
    %c0_i32 = arith.constant 0 : i32
    %c0_i32_0 = arith.constant 0 : i32
    return %c0_i32, %arg1 : i32, i32
  }
  func.func @transform_3(%arg0: i32, %arg1: i32) -> (i32, i32) {
    %c0_i32 = arith.constant 0 : i32
    %c0_i32_0 = arith.constant 0 : i32
    return %c0_i32, %arg1 : i32, i32
  }
  func.func @transform_4(%arg0: i32, %arg1: i32) -> (i32, i32) {
    %c0_i32 = arith.constant 0 : i32
    return %arg0, %arg1 : i32, i32
  }
}

</mosaic_0001>

<bundles_post_ra>
// kernel: tpu_custom_call.1
= control target key start
LH: loop header
LB: loop body
LE: loop exit
PB: predicated region body
PF: predicated region fallthrough
CT: control target
= control target key end

     0   :  { %vm83_vm0 = vcmask 130048   ;;  %s448_s0 = inlined_call_operand.vmem [shape: bf16[128,16], index: 0, kind: input, shape index: {}]   ;;  %s449_s1 = inlined_call_operand.vmem [shape: bf16[16,128], index: 1, kind: input, shape index: {}]   ;;  %s450_s2 = inlined_call_operand.vmem [shape: f32[1,128], index: 2, kind: input, shape index: {}]   ;;  %s451_s3 = inlined_call_operand.vmem [shape: f32[1,128], index: 3, kind: input, shape index: {}]   ;;  %s452_s4 = inlined_call_operand.hbm [shape: f32[128,128], index: 4, kind: output, shape index: {}]  }
   0x1   :  { %v334_v0 = vld [vmem:[%s449_s1] sm:$0xff]   ;;  %v337_v3 = vld [vmem:[%s448_s0 + $0x8] sm:$0xff]   ;;  %v339_v5 = vld [vmem:[%s448_s0 + $0x10] sm:$0xff]  }
   0x2   :  { %v335_v1 = vld [vmem:[%s448_s0] sm:$0xff]   ;;  %311 = vmatprep.subr.bf16.mxu0 %v334_v0  ;;  %329 = vmatprep.subr.bf16.mxu1 %v334_v0  ;;  %v338_v4 = vld [vmem:[%s448_s0 + $0x28] sm:$0xff]   ;;  %v340_v6 = vld [vmem:[%s448_s0 + $0x30] sm:$0xff]  }
   0x3   :  { %v336_v2 = vld [vmem:[%s448_s0 + $0x20] sm:$0xff]   ;;  %312 = vmatpush3.bf16.msra.mxu0 %v334_v0  ;;  %330 = vmatpush3.bf16.msra.mxu1 %v334_v0 }
   0x4   :  { %313 = vmatprep.mubr.msk.bf16.mxu0 %vm83_vm0, %v335_v1  ;;  %321 = vmatprep.mubr.msk.bf16.mxu1 %vm83_vm0, %v336_v2 }
   0x6   :  { %314 = vmatmul.mubr.msk.bf16.vlgmr.msra.gmra.mrb[0].mxu0 %vm83_vm0, %v337_v3  ;;  %322 = vmatmul.mubr.msk.bf16.vlgmr.msra.gmra.mrb[0].mxu1 %vm83_vm0, %v338_v4 }
   0x7   :  { %317 = vmatprep.mubr.msk.bf16.mxu0 %vm83_vm0, %v339_v5  ;;  %325 = vmatprep.mubr.msk.bf16.mxu1 %vm83_vm0, %v340_v6 }
   0x8   :  { %9 = vsyncpa [#allocation3], 0  ;;  %v341_v7 = vld [vmem:[%s448_s0 + $0x18] sm:$0xff]   ;;  %v300_v9 = vld [vmem:[%s450_s2] ss:$0 sm:$0xff] }
   0x9   :  { %v342_v8 = vld [vmem:[%s448_s0 + $0x38] sm:$0xff]   ;;  %v301_v11 = vld [vmem:[%s451_s3] ss:$0 sm:$0xff]  ;;  %s367_s0 = smov [#allocation2]  }
   0xa   :  { %s272_s2 = sshll.u32 %s367_s0, 4  ;;  %s273_s2 = int_to_ptr.vmem [resolvable:$true] %s272_s2 }
   0xb   :  { %s343_s3 = scalar_lea.vmem %s273_s2, 2048  ;;  %p348_p1 = scmp.lt.s32.totalorder %s273_s2, %s273_s2 }
   0xc   :  { %p344_p0 = scmp.ne.s32.totalorder %s273_s2, %s343_s3  ;;  %p349_p2 = scmp.lt.s32.totalorder %s343_s3, %s343_s3 }
   0xe   :  { %318 = vmatmul.mubr.msk.bf16.gmra.mrb[4].mxu0 %vm83_vm0, %v341_v7  ;;  %326 = vmatmul.mubr.msk.bf16.gmra.mrb[4].mxu1 %vm83_vm0, %v342_v8  ;;  %p350_p3 = por %p349_p2, %p348_p1 }
  0x10   :  { %p351_p4 = pnand %p350_p3, %p344_p0 }
  0xd9   :  { %v315_v10 = vpop.f32.mrb[0].mxu0  ;;  %v323_v12 = vpop.f32.mrb[0].mxu1 }
  0xda   :  { %v214_v13 = vmul.f32 %v315_v10, %v300_v9  ;;  %v222_v14 = vmul.f32 %v323_v12, %v300_v9  ;;  %v142_v15 = vpop.f32.mrb[1].mxu0  ;;  %v174_v16 = vpop.f32.mrb[1].mxu1 }
  0xdb   :  { %v212_v17 = vmul.f32 %v300_v9, %v142_v15  ;;  %v220_v18 = vmul.f32 %v300_v9, %v174_v16  ;;  %v316_v19 = vpop.f32.mrb[2].mxu0  ;;  %v324_v20 = vpop.f32.mrb[2].mxu1 }
  0xdc   :  { %v237_v21 = vadd.f32 %v301_v11, %v214_v13  ;;  %v245_v22 = vadd.f32 %v301_v11, %v222_v14  ;;  %v215_v23 = vmul.f32 %v316_v19, %v300_v9  ;;  %v223_v24 = vmul.f32 %v324_v20, %v300_v9  ;;  %v145_v25 = vpop.f32.mrb[3].mxu0  ;;  %v177_v26 = vpop.f32.mrb[3].mxu1 }
  0xdd   :  { %v235_v27 = vadd.f32 %v301_v11, %v212_v17  ;;  %v243_v28 = vadd.f32 %v301_v11, %v220_v18  ;;  %v213_v29 = vmul.f32 %v300_v9, %v145_v25  ;;  %v221_v30 = vmul.f32 %v300_v9, %v177_v26 }
  0xde   :  { %253 = vst [vmem:[#allocation2 + $0x10] sm:$0xff] %v237_v21  ;;  %261 = vst [vmem:[#allocation2 + $0x50] sm:$0xff] %v245_v22  ;;  %v238_v31 = vadd.f32 %v301_v11, %v215_v23  ;;  %v246_v32 = vadd.f32 %v301_v11, %v223_v24 }
  0xdf   :  { %251 = vst [vmem:[#allocation2] sm:$0xff] %v235_v27  ;;  %259 = vst [vmem:[#allocation2 + $0x40] sm:$0xff] %v243_v28  ;;  %v236_v33 = vadd.f32 %v301_v11, %v213_v29  ;;  %v244_v34 = vadd.f32 %v301_v11, %v221_v30 }
  0xe0   :  { %254 = vst [vmem:[#allocation2 + $0x18] sm:$0xff] %v238_v31  ;;  %262 = vst [vmem:[#allocation2 + $0x58] sm:$0xff] %v246_v32 }
  0xe1   :  { %252 = vst [vmem:[#allocation2 + $0x8] sm:$0xff] %v236_v33  ;;  %260 = vst [vmem:[#allocation2 + $0x48] sm:$0xff] %v244_v34  ;;  %v319_v35 = vpop.f32.mrb[4].mxu0  ;;  %v327_v36 = vpop.f32.mrb[4].mxu1 }
  0xe2   :  { %v218_v37 = vmul.f32 %v319_v35, %v300_v9  ;;  %v226_v38 = vmul.f32 %v327_v36, %v300_v9  ;;  %v158_v39 = vpop.f32.mrb[5].mxu0  ;;  %v190_v40 = vpop.f32.mrb[5].mxu1 }
  0xe3   :  { %v216_v41 = vmul.f32 %v300_v9, %v158_v39  ;;  %v224_v42 = vmul.f32 %v300_v9, %v190_v40  ;;  %v320_v43 = vpop.f32.mrb[6].mxu0  ;;  %v328_v44 = vpop.f32.mrb[6].mxu1 }
  0xe4   :  { %v241_v45 = vadd.f32 %v301_v11, %v218_v37  ;;  %v249_v46 = vadd.f32 %v301_v11, %v226_v38  ;;  %v219_v47 = vmul.f32 %v320_v43, %v300_v9  ;;  %v227_v48 = vmul.f32 %v328_v44, %v300_v9  ;;  %v161_v49 = vpop.f32.mrb[7].mxu0  ;;  %v193_v50 = vpop.f32.mrb[7].mxu1 }
  0xe5   :  { %v239_v51 = vadd.f32 %v301_v11, %v216_v41  ;;  %v247_v52 = vadd.f32 %v301_v11, %v224_v42  ;;  %v217_v53 = vmul.f32 %v300_v9, %v161_v49  ;;  %v225_v54 = vmul.f32 %v300_v9, %v193_v50 }
  0xe6   :  { %257 = vst [vmem:[#allocation2 + $0x30] sm:$0xff] %v241_v45  ;;  %265 = vst [vmem:[#allocation2 + $0x70] sm:$0xff] %v249_v46  ;;  %v242_v55 = vadd.f32 %v301_v11, %v219_v47  ;;  %v250_v56 = vadd.f32 %v301_v11, %v227_v48 }
  0xe7   :  { %255 = vst [vmem:[#allocation2 + $0x20] sm:$0xff] %v239_v51  ;;  %263 = vst [vmem:[#allocation2 + $0x60] sm:$0xff] %v247_v52  ;;  %v240_v57 = vadd.f32 %v301_v11, %v217_v53  ;;  %v248_v58 = vadd.f32 %v301_v11, %v225_v54 }
  0xe8   :  { %258 = vst [vmem:[#allocation2 + $0x38] sm:$0xff] %v242_v55  ;;  %266 = vst [vmem:[#allocation2 + $0x78] sm:$0xff] %v250_v56 }
  0xe9   :  { %256 = vst [vmem:[#allocation2 + $0x28] sm:$0xff] %v240_v57  ;;  %264 = vst [vmem:[#allocation2 + $0x68] sm:$0xff] %v248_v58 }
  0xea   :  { %354 = shalt.err (!%p351_p4)
}
  0xeb   :  { %s355_s12 = scalar_lea.hbm %s452_s4, 2048 }
  0xec   :  { %p356_p5 = scmp.ne.s32.totalorder %s452_s4, %s355_s12  ;;  %p359_p6 = scmp.lt.u32.totalorder %s355_s12, %s452_s4 }
  0xee   :  { %p361_p7 = pnand %p359_p6, %p356_p5 }
  0xf0   :  { %364 = shalt.err (!%p361_p7)
}
  0xf1   :  { %s368_s17 = smov 128   ;;  %s369_s18 = smov 8  }
  0xf2   :  { %278 = dma.vmem_to_hbm [thread:$0]  %s273_s2, 2048, %s452_s4, [#allocation3], %s368_s17, %s368_s17, %s369_s18  }
  0xf3   :  { %365 = dma.done.wait [#allocation3], 2048  }
  0xf4   :  { %366 = vsyncadd [#allocation3], 4294965248 }
  0xf5   :  { %282 = vsyncpa [#allocation3], 1 }

</bundles_post_ra>
